<compile_context>
chip_gen: v7x
topology: tpu7x:2x2x1
jax: 0.10.0
libtpu: 0.0.40
codegen_flags: <defaults>
</compile_context>

<pallas_src>
import jax
import jax.numpy as jnp
from jax.experimental import pallas as pl
from jax.experimental.pallas import tpu as pltpu

# ----------------------------- model dimensions ------------------------------
BATCH = 2
INPUT_DIM = 80     # FeatureProjector input_dim (module default)
EMBED_DIM = 128    # FeatureProjector embed_dim (lane-aligned stand-in for 512)
SEQ_LEN = 8
VOCAB = 128        # synthetic LM vocab (lane-aligned)
LM_DIM = 128       # synthetic LM hidden size (lane-aligned)
IGNORE_INDEX = -100


# --------------------------- projector kernel ---------------------------------
def projector_kernel(x_ref, w1_ref, b1_ref, w2_ref, b2_ref, o_ref):
    # Linear(in, emb) -> Mish -> Linear(emb, emb). bf16 matmuls with f32
    # accumulation on the MXU; transcendentals stay in f32 (no bf16 EUP on v5e).
    xb = x_ref[...].astype(jnp.bfloat16)
    h1 = jnp.dot(xb, w1_ref[...], preferred_element_type=jnp.float32) + b1_ref[...]
    # Mish(h) = h * tanh(softplus(h)); numerically stable softplus form.
    sp = jnp.maximum(h1, 0.0) + jnp.log1p(jnp.exp(-jnp.abs(h1)))
    mish = h1 * jnp.tanh(sp)
    o_ref[...] = (jnp.dot(mish.astype(jnp.bfloat16), w2_ref[...],
                          preferred_element_type=jnp.float32) + b2_ref[...]
                  ).astype(o_ref.dtype)


def feature_projector(params, x):
    B = x.shape[0]
    return pl.pallas_call(
        projector_kernel,
        out_shape=jax.ShapeDtypeStruct((B, EMBED_DIM), jnp.float32),
        in_specs=[pl.BlockSpec(memory_space=pltpu.MemorySpace.VMEM)] * 5,
        out_specs=pl.BlockSpec(memory_space=pltpu.MemorySpace.VMEM),
    )(x, params["w1"], params["b1"], params["w2"], params["b2"])


# --------------------------- LM-loss kernel -----------------------------------
def lm_loss_kernel(meta_ref, emb_ref, wh_ref, bh_ref, loss_ref):
    rows_pad = meta_ref.shape[0]
    V = wh_ref.shape[1]

    ids = meta_ref[:, 0:1]        # (rows_pad, 1) input tokens at positions 0..S-2
    tgt = meta_ref[:, 1:2]        # (rows_pad, 1) shifted labels (pad rows = -100)

    # One-hot MXU gather: replaces the serialized per-row scalar gather loop.
    # OOB / padded ids simply produce an all-zero hidden row (no VMEM hazard).
    lane = jax.lax.broadcasted_iota(jnp.int32, (rows_pad, V), 1)
    onehot = (lane == ids).astype(jnp.bfloat16)                        # (rows_pad, V)
    hidden = jnp.dot(onehot, emb_ref[...],
                     preferred_element_type=jnp.float32).astype(jnp.bfloat16)

    # lm_head. TODO(synk): at real LM scale (V >= 32k, D >= 512) tile the vocab
    # dim as a trailing "arbitrary" grid axis with an online-logsumexp VMEM
    # accumulator (v7x has only 64 MiB VMEM), use 256-multiple tiles on v6e/v7x
    # (128 on v5e), and shard a leading row axis "parallel" for v7x's 2 TCs.
    logits = jnp.dot(hidden, wh_ref[...],
                     preferred_element_type=jnp.float32) + bh_ref[...]  # (rows_pad, V)

    # Shifted cross-entropy, ignore_index = -100, mean reduction.
    m = jnp.max(logits, axis=-1, keepdims=True)
    lse = m + jnp.log(jnp.sum(jnp.exp(logits - m), axis=-1, keepdims=True))
    picked = jnp.sum(jnp.where(lane == tgt, logits, 0.0), axis=-1, keepdims=True)
    valid = (tgt != IGNORE_INDEX).astype(jnp.float32)
    num = jnp.sum((lse - picked) * valid)
    den = jnp.sum(valid)   # matches HF CrossEntropyLoss(mean): NaN if no valid targets
    loss_ref[0, 0] = num / den


# ------------------------------ wrapper ---------------------------------------
def projector_text_model_loss(params, x, input_ids, labels):
    B, S = input_ids.shape
    rows = B * (S - 1)
    rows_pad = ((rows + 15) // 16) * 16   # bf16 packs 16 sublanes per vreg

    # `_ = self.projector(x)`: computed and discarded, exactly like the module.
    _ = feature_projector(params, x)

    # Host-side layout plumbing: fold gather ids (tokens 0..S-2) and shifted
    # labels (tokens 1..S-1) into ONE (rows_pad, 2) int32 operand. Pad rows get
    # id 0 (harmless gather) and label -100 (masked out of the loss).
    shift_ids = input_ids[:, : S - 1].reshape(rows, 1).astype(jnp.int32)
    shift_ids = jnp.pad(shift_ids, ((0, rows_pad - rows), (0, 0)),
                        constant_values=0)
    shift_labels = labels[:, 1:].reshape(rows, 1).astype(jnp.int32)
    shift_labels = jnp.pad(shift_labels, ((0, rows_pad - rows), (0, 0)),
                           constant_values=IGNORE_INDEX)
    meta = jnp.concatenate([shift_ids, shift_labels], axis=1)   # (rows_pad, 2)

    loss = pl.pallas_call(
        lm_loss_kernel,
        out_shape=jax.ShapeDtypeStruct((1, 1), jnp.float32),
        in_specs=[pl.BlockSpec(memory_space=pltpu.MemorySpace.VMEM)] * 4,
        out_specs=pl.BlockSpec(memory_space=pltpu.MemorySpace.SMEM),
    )(meta, params["emb"], params["wh"], params["bh"])
    return loss[0, 0]


# --------------------------------- main ---------------------------------------
if __name__ == "__main__":
    key = jax.random.PRNGKey(0)
    ks = jax.random.split(key, 10)

    params = {
        # FeatureProjector weights, pre-transposed for (B,K)@(K,N) matmuls;
        # matrices bf16 for the MXU (f32 accumulation in-kernel), biases f32.
        "w1": (jax.random.normal(ks[0], (INPUT_DIM, EMBED_DIM), jnp.float32) * 0.05).astype(jnp.bfloat16),
        "b1": jax.random.normal(ks[1], (1, EMBED_DIM), jnp.float32) * 0.05,
        "w2": (jax.random.normal(ks[2], (EMBED_DIM, EMBED_DIM), jnp.float32) * 0.05).astype(jnp.bfloat16),
        "b2": jax.random.normal(ks[3], (1, EMBED_DIM), jnp.float32) * 0.05,
        # Synthetic frozen language model: embedding + lm_head weight in bf16
        # (hidden is consumed in bf16 by the lm_head matmul anyway), bias f32.
        "emb": (jax.random.normal(ks[4], (VOCAB, LM_DIM), jnp.float32) * 0.05).astype(jnp.bfloat16),
        "wh": (jax.random.normal(ks[5], (LM_DIM, VOCAB), jnp.float32) * 0.05).astype(jnp.bfloat16),
        "bh": jax.random.normal(ks[6], (1, VOCAB), jnp.float32) * 0.05,
    }

    # Example inputs.
    x = jax.random.normal(ks[7], (BATCH, INPUT_DIM), jnp.float32)
    input_ids = jax.random.randint(ks[8], (BATCH, SEQ_LEN), 0, VOCAB, jnp.int32)
    labels = jax.random.randint(ks[9], (BATCH, SEQ_LEN), 0, VOCAB, jnp.int32)
    labels = labels.at[:, 0].set(IGNORE_INDEX)   # ignored prompt positions, as in HF fine-tuning

    loss = projector_text_model_loss(params, x, input_ids, labels)
    loss = jax.block_until_ready(loss)

    assert loss.shape == ()
    assert bool(jnp.isfinite(loss))
    print("KERNEL_OK")
</pallas_src>

<mosaic_0001>
module attributes {stable_mosaic.version = 11 : i64} {
  func.func @projector_kernel(%arg0: memref<2x80xf32, #tpu.memory_space<vmem>>, %arg1: memref<80x128xbf16, #tpu.memory_space<vmem>>, %arg2: memref<1x128xf32, #tpu.memory_space<vmem>>, %arg3: memref<128x128xbf16, #tpu.memory_space<vmem>>, %arg4: memref<1x128xf32, #tpu.memory_space<vmem>>, %arg5: memref<2x128xf32, #tpu.memory_space<vmem>>) attributes {dimension_semantics = [], scalar_prefetch = 0 : i64, scratch_operands = 0 : i64, tpu.core_type = #tpu.core_type<tc>} {
    %c0 = arith.constant 0 : index
    %c0_0 = arith.constant 0 : index
    %0 = vector.load %arg0[%c0, %c0_0] : memref<2x80xf32, #tpu.memory_space<vmem>>, vector<2x80xf32>
    %1 = arith.truncf %0 : vector<2x80xf32> to vector<2x80xbf16>
    %c0_1 = arith.constant 0 : index
    %c0_2 = arith.constant 0 : index
    %2 = vector.load %arg1[%c0_1, %c0_2] : memref<80x128xbf16, #tpu.memory_space<vmem>>, vector<80x128xbf16>
    %cst = arith.constant dense<0.000000e+00> : vector<2x128xf32>
    %3 = tpu.matmul %1, %2, %cst {dimension_numbers = #tpu.dot_dimension_numbers<[1], [0], [0], [1], [0, 0, 1, 1], [], []>} : vector<2x80xbf16>, vector<80x128xbf16>, vector<2x128xf32> -> vector<2x128xf32>
    %c0_3 = arith.constant 0 : index
    %c0_4 = arith.constant 0 : index
    %4 = vector.load %arg2[%c0_3, %c0_4] : memref<1x128xf32, #tpu.memory_space<vmem>>, vector<1x128xf32>
    %5 = vector.broadcast %4 : vector<1x128xf32> to vector<2x128xf32>
    %6 = arith.addf %3, %5 : vector<2x128xf32>
    %cst_5 = arith.constant 0.000000e+00 : f32
    %7 = vector.broadcast %cst_5 : f32 to vector<2x128xf32>
    %8 = arith.maximumf %6, %7 : vector<2x128xf32>
    %9 = math.absf %6 : vector<2x128xf32>
    %cst_6 = arith.constant 0.000000e+00 : f32
    %10 = vector.broadcast %cst_6 : f32 to vector<2x128xf32>
    %11 = arith.subf %10, %9 : vector<2x128xf32>
    %12 = math.exp %11 : vector<2x128xf32>
    %13 = math.log1p %12 : vector<2x128xf32>
    %14 = arith.addf %8, %13 : vector<2x128xf32>
    %15 = math.tanh %14 : vector<2x128xf32>
    %16 = arith.mulf %6, %15 : vector<2x128xf32>
    %17 = arith.truncf %16 : vector<2x128xf32> to vector<2x128xbf16>
    %c0_7 = arith.constant 0 : index
    %c0_8 = arith.constant 0 : index
    %18 = vector.load %arg3[%c0_7, %c0_8] : memref<128x128xbf16, #tpu.memory_space<vmem>>, vector<128x128xbf16>
    %cst_9 = arith.constant dense<0.000000e+00> : vector<2x128xf32>
    %19 = tpu.matmul %17, %18, %cst_9 {dimension_numbers = #tpu.dot_dimension_numbers<[1], [0], [0], [1], [0, 0, 1, 1], [], []>} : vector<2x128xbf16>, vector<128x128xbf16>, vector<2x128xf32> -> vector<2x128xf32>
    %c0_10 = arith.constant 0 : index
    %c0_11 = arith.constant 0 : index
    %20 = vector.load %arg4[%c0_10, %c0_11] : memref<1x128xf32, #tpu.memory_space<vmem>>, vector<1x128xf32>
    %21 = vector.broadcast %20 : vector<1x128xf32> to vector<2x128xf32>
    %22 = arith.addf %19, %21 : vector<2x128xf32>
    %c0_12 = arith.constant 0 : index
    %c0_13 = arith.constant 0 : index
    %23 = vector.load %arg5[%c0_12, %c0_13] : memref<2x128xf32, #tpu.memory_space<vmem>>, vector<2x128xf32>
    tpu.vector_store %arg5[%c0_12, %c0_13], %22 {strides = array<i32>} : memref<2x128xf32, #tpu.memory_space<vmem>>, vector<2x128xf32>,
    return
  }
}

</mosaic_0001>

<bundles_post_ra>
// kernel: tpu_custom_call.1
= control target key start
LH: loop header
LB: loop body
LE: loop exit
PB: predicated region body
PF: predicated region fallthrough
CT: control target
= control target key end

     0   :  { %10 = vsyncpa [#allocation3], 0  ;;  %s584_s0 = inlined_call_operand.hbm [shape: f32[2,80], index: 0, kind: input, shape index: {}]   ;;  %s585_s1 = inlined_call_operand.hbm [shape: bf16[80,128], index: 1, kind: input, shape index: {}]   ;;  %s586_s2 = inlined_call_operand.vmem [shape: f32[1,128], index: 2, kind: input, shape index: {}]   ;;  %s587_s3 = inlined_call_operand.hbm [shape: bf16[128,128], index: 3, kind: input, shape index: {}]   ;;  %s588_s4 = inlined_call_operand.vmem [shape: f32[1,128], index: 4, kind: input, shape index: {}]   ;;  %s589_s5 = inlined_call_operand.hbm [shape: f32[2,128], index: 5, kind: output, shape index: {}]  }
   0x1   :  { %11 = vsyncpa [#allocation6], 0 }
   0x2   :  { %12 = vsyncpa [#allocation4], 0  ;;  %s486_s18 = smov [#allocation5]   ;;  %s392_s22 = scalar_lea.hbm %s585_s1, 640 }
   0x3   :  { %s28_s19 = sshll.u32 %s486_s18, 4  ;;  %p393_p0 = scmp.ne.s32.totalorder %s585_s1, %s392_s22  ;;  %s29_s19 = int_to_ptr.vmem [resolvable:$true] %s28_s19 }
   0x4   :  { %p396_p1 = scmp.lt.u32.totalorder %s392_s22, %s585_s1 }
   0x6   :  { %p398_p2 = pnand %p396_p1, %p393_p0 }
   0x8   :  { %401 = shalt.err (!%p398_p2)
}
   0x9   :  { %s402_s27 = scalar_lea.vmem %s29_s19, 640  ;;  %p407_p4 = scmp.lt.s32.totalorder %s29_s19, %s29_s19 }
   0xa   :  { %p403_p3 = scmp.ne.s32.totalorder %s29_s19, %s402_s27  ;;  %p408_p5 = scmp.lt.s32.totalorder %s402_s27, %s402_s27 }
   0xc   :  { %p409_p6 = por %p408_p5, %p407_p4 }
   0xe   :  { %p410_p7 = pnand %p409_p6, %p403_p3 }
  0x10   :  { %413 = shalt.err (!%p410_p7)
}
  0x11   :  { %s487_s28 = smov 64   ;;  %s488_s29 = smov 4  }
  0x12   :  { %34 = dma.hbm_to_vmem [thread:$0]  %s585_s1, 640, %s29_s19, [#allocation6], %s487_s28, %s487_s28, %s488_s29  }
  0x13   :  { %s489_s7 = smov [#allocation2]   ;;  %s490_s9 = smov [#allocation7]  }
  0x14   :  { %s19_s8 = sshll.u32 %s489_s7, 4  ;;  %s42_s10 = sshll.u32 %s490_s9, 4  ;;  %s20_s8 = int_to_ptr.vmem [resolvable:$true] %s19_s8  ;;  %s43_s10 = int_to_ptr.vmem [resolvable:$true] %s42_s10 }
  0x15   :  { %s414_s13 = scalar_lea.hbm %s584_s0, 32 }
  0x16   :  { %p415_p8 = scmp.ne.s32.totalorder %s584_s0, %s414_s13  ;;  %p418_p9 = scmp.lt.u32.totalorder %s414_s13, %s584_s0 }
  0x18   :  { %p420_p10 = pnand %p418_p9, %p415_p8 }
  0x1a   :  { %423 = shalt.err (!%p420_p10)
}
  0x1b   :  { %s424_s1 = scalar_lea.vmem %s20_s8, 32  ;;  %p429_p12 = scmp.lt.s32.totalorder %s20_s8, %s20_s8 }
  0x1c   :  { %p425_p11 = scmp.ne.s32.totalorder %s20_s8, %s424_s1  ;;  %p430_p13 = scmp.lt.s32.totalorder %s424_s1, %s424_s1 }
  0x1e   :  { %p431_p0 = por %p430_p13, %p429_p12 }
  0x20   :  { %p432_p1 = pnand %p431_p0, %p425_p11 }
  0x22   :  { %435 = shalt.err (!%p432_p1)
}
  0x23   :  { %22 = dma.hbm_to_vmem [thread:$0]  %s584_s0, 32, %s20_s8, [#allocation3]  }
  0x24   :  { %s436_s22 = scalar_lea.hbm %s587_s3, 1024 }
  0x25   :  { %p437_p2 = scmp.ne.s32.totalorder %s587_s3, %s436_s22  ;;  %p440_p3 = scmp.lt.u32.totalorder %s436_s22, %s587_s3 }
  0x27   :  { %p442_p4 = pnand %p440_p3, %p437_p2 }
  0x29   :  { %445 = shalt.err (!%p442_p4)
}
  0x2a   :  { %s446_s27 = scalar_lea.vmem %s43_s10, 1024  ;;  %p451_p6 = scmp.lt.s32.totalorder %s43_s10, %s43_s10 }
  0x2b   :  { %p447_p5 = scmp.ne.s32.totalorder %s43_s10, %s446_s27  ;;  %p452_p7 = scmp.lt.s32.totalorder %s446_s27, %s446_s27 }
  0x2d   :  { %p453_p8 = por %p452_p7, %p451_p6 }
  0x2f   :  { %p454_p9 = pnand %p453_p8, %p447_p5 }
  0x31   :  { %457 = shalt.err (!%p454_p9)
}
  0x32   :  { %48 = dma.hbm_to_vmem [thread:$0]  %s587_s3, 1024, %s43_s10, [#allocation6], %s487_s28, %s487_s28, %s488_s29  }
  0x33   :  { %480 = dma.done.wait [#allocation3], 32  }
  0x34   :  { %481 = vsyncadd [#allocation3], 4294967264 }
  0x35   :  { %482 = dma.done.wait [#allocation6], 1664  }
  0x36   :  { %483 = vsyncadd [#allocation6], 4294965632  ;;  %v491_v0 = vmov 0.0   ;;  %vm492_vm0 = vmmov 0   ;;  %v373_v1 = vld [vmem:[#allocation5] sm:$0xff]   ;;  %v374_v2 = vld [vmem:[#allocation5 + $0x8] sm:$0xff]  }
  0x37   :  { %331 = vmatprep.subr.bf16.mxu0 %v491_v0  ;;  %341 = vmatprep.mubr.msk.bf16.mxu0 %vm492_vm0, %v491_v0  ;;  %v375_v3 = vld [vmem:[#allocation5 + $0x10] sm:$0xff]   ;;  %v376_v4 = vld [vmem:[#allocation5 + $0x18] sm:$0xff]   ;;  %v377_v5 = vld [vmem:[#allocation5 + $0x20] sm:$0xff]   ;;  %vm110_vm1 = vcmask 654336   ;;  %s493_s6 = smov [#allocation8]  }
  0x38   :  { %345 = vmatprep.subr.bf16.mxu1 %v491_v0  ;;  %361 = vmatprep.mubr.msk.bf16.mxu1 %vm492_vm0, %v491_v0  ;;  %v61_v6 = vld [vmem:[#allocation2] sm:$0x3]  ;;  %v378_v8 = vld [vmem:[#allocation7] sm:$0xff]   ;;  %v379_v9 = vld [vmem:[#allocation7 + $0x8] sm:$0xff]   ;;  %s290_s7 = sshll.u32 %s493_s6, 4  ;;  %s291_s7 = int_to_ptr.vmem [resolvable:$true] %s290_s7 }
  0x39   :  { %332 = vmatpush3.bf16.msra.mxu0 %v373_v1  ;;  %v62_v7 = vpack.c.bf16 %v61_v6, %v61_v6  ;;  %346 = vmatpush3.bf16.msra.mxu1 %v378_v8  ;;  %v380_v10 = vld [vmem:[#allocation7 + $0x10] sm:$0xff]   ;;  %v381_v11 = vld [vmem:[#allocation7 + $0x18] sm:$0xff]   ;;  %v382_v12 = vld [vmem:[#allocation7 + $0x20] sm:$0xff]   ;;  %s458_s8 = scalar_lea.vmem %s291_s7, 32  ;;  %p463_p11 = scmp.lt.s32.totalorder %s291_s7, %s291_s7 }
  0x3a   :  { %333 = vmatprep.subr.bf16.mxu0 %v491_v0  ;;  %347 = vmatprep.subr.bf16.mxu1 %v491_v0  ;;  %v383_v13 = vld [vmem:[#allocation7 + $0x28] sm:$0xff]   ;;  %v384_v14 = vld [vmem:[#allocation7 + $0x30] sm:$0xff]   ;;  %v385_v15 = vld [vmem:[#allocation7 + $0x38] sm:$0xff]   ;;  %p459_p10 = scmp.ne.s32.totalorder %s291_s7, %s458_s8  ;;  %p464_p12 = scmp.lt.s32.totalorder %s458_s8, %s458_s8 }
  0x3b   :  { %v300_v16 = vld [vmem:[%s586_s2] ss:$0 sm:$0xff] }
  0x3c   :  { %v307_v39 = vld [vmem:[%s588_s4] ss:$0 sm:$0xff]  ;;  %p465_p13 = por %p464_p12, %p463_p11 }
  0x3d   :  { %334 = vmatpush3.bf16.msra.mxu0 %v374_v2  ;;  %348 = vmatpush3.bf16.msra.mxu1 %v379_v9 }
  0x3e   :  { %335 = vmatprep.subr.bf16.mxu0 %v491_v0  ;;  %349 = vmatprep.subr.bf16.mxu1 %v491_v0  ;;  %p466_p0 = pnand %p465_p13, %p459_p10 }
  0x41   :  { %336 = vmatpush3.bf16.msra.mxu0 %v375_v3  ;;  %350 = vmatpush3.bf16.msra.mxu1 %v380_v10 }
  0x42   :  { %337 = vmatprep.subr.bf16.mxu0 %v491_v0  ;;  %351 = vmatprep.subr.bf16.mxu1 %v491_v0 }
  0x45   :  { %338 = vmatpush3.bf16.msra.mxu0 %v376_v4  ;;  %352 = vmatpush3.bf16.msra.mxu1 %v381_v11 }
  0x46   :  { %339 = vmatprep.subr.bf16.mxu0 %v491_v0  ;;  %353 = vmatprep.subr.bf16.mxu1 %v491_v0 }
  0x49   :  { %340 = vmatpush3.bf16.msra.mxu0 %v377_v5  ;;  %354 = vmatpush3.bf16.msra.mxu1 %v382_v12 }
  0x4a   :  { %355 = vmatprep.subr.bf16.mxu1 %v491_v0 }
  0x4c   :  { %342 = vmatmul.mubr.msk.bf16.vlgmr.msra.gmra.mrb[0].mxu0 %vm110_vm1, %v62_v7 }
  0x4d   :  { %356 = vmatpush3.bf16.msra.mxu1 %v383_v13 }
  0x4e   :  { %357 = vmatprep.subr.bf16.mxu1 %v491_v0 }
  0x51   :  { %358 = vmatpush3.bf16.msra.mxu1 %v384_v14 }
  0x52   :  { %359 = vmatprep.subr.bf16.mxu1 %v491_v0 }
  0x55   :  { %360 = vmatpush3.bf16.msra.mxu1 %v385_v15 }
 0x11f   :  { %v148_v17 = vpop.f32.mrb[0].mxu0 }
 0x120   :  { %v149_v18 = vadd.f32 %v300_v16, %v148_v17  ;;  %v343_v19 = vpop.f32.mrb[1].mxu0 }
 0x121   :  { %v151_v20 = vpop.f32.mrb[2].mxu0 }
 0x122   :  { %v155_v21 = vand.u32 2147483647, %v149_v18  ;;  %v344_v22 = vpop.f32.mrb[3].mxu0  ;;  %v154_v33 = vmax.f32 %v149_v18, 0.0 }
 0x124   :  { %v156_v23 = vsub.f32 0.0, %v155_v21 }
 0x126   :  { %v157_v24 = vmul.f32 1.442695, %v156_v23 }
 0x128   :  { %386 = vpow2.f32 %v157_v24 }
 0x132   :  { %v387_v25 = vpop.eup %386 }
 0x133   :  { %v159_v26 = vadd.f32 1.0, %v387_v25  ;;  %v162_v27 = vmul.f32 -0.5, %v387_v25  ;;  %v165_v29 = vand.u32 2147483647, %v387_v25 }
 0x135   :  { %388 = vlog2.f32 %v159_v26  ;;  %v163_v28 = vadd.f32 1.0, %v162_v27  ;;  %vm166_vm2 = vcmp.lt.f32.partialorder %v165_v29, 0.0004427343 }
 0x137   :  { %v164_v32 = vmul.f32 %v387_v25, %v163_v28 }
 0x13f   :  { %v389_v30 = vpop.eup %388 }
 0x140   :  { %v161_v31 = vmul.f32 0.6931472, %v389_v30 }
 0x142   :  { %v167_v34 = vsel %vm166_vm2, %v164_v32, %v161_v31 }
 0x143   :  { %v168_v35 = vadd.f32 %v167_v34, %v154_v33 }
 0x145   :  { %390 = vtanh.f32 %v168_v35 }
 0x14f   :  { %v391_v36 = vpop.eup %390 }
 0x150   :  { %v170_v37 = vmul.f32 %v391_v36, %v149_v18 }
 0x152   :  { %v171_v38 = vpack.c.bf16 %v170_v37, %v170_v37 }
 0x154   :  { %362 = vmatmul.mubr.bf16.vlgmr.msra.gmra.mrb[0].mxu1 %v171_v38 }
 0x227   :  { %v277_v40 = vpop.f32.mrb[0].mxu1 }
 0x228   :  { %v278_v41 = vadd.f32 %v307_v39, %v277_v40  ;;  %v363_v42 = vpop.f32.mrb[1].mxu1 }
 0x229   :  { %v280_v43 = vpop.f32.mrb[2].mxu1 }
 0x22a   :  { %283 = vst [vmem:[#allocation8] sm:$0x3] %v278_v41  ;;  %v364_v44 = vpop.f32.mrb[3].mxu1 }
 0x22b   :  { %469 = shalt.err (!%p466_p0)
}
 0x22c   :  { %s470_s4 = scalar_lea.hbm %s589_s5, 32 }
 0x22d   :  { %p471_p1 = scmp.ne.s32.totalorder %s589_s5, %s470_s4  ;;  %p474_p2 = scmp.lt.u32.totalorder %s470_s4, %s589_s5 }
 0x22f   :  { %p476_p3 = pnand %p474_p2, %p471_p1 }
 0x231   :  { %479 = shalt.err (!%p476_p3)
}
 0x232   :  { %293 = dma.vmem_to_hbm [thread:$0]  %s291_s7, 32, %s589_s5, [#allocation4]  }
 0x233   :  { %484 = dma.done.wait [#allocation4], 32  }
 0x234   :  { %485 = vsyncadd [#allocation4], 4294967264 }
 0x235   :  { %297 = vsyncpa [#allocation3], 1 }
 0x236   :  { %298 = vsyncpa [#allocation6], 1 }
 0x237   :  { %299 = vsyncpa [#allocation4], 1 }

</bundles_post_ra>
